<compile_context>
chip_gen: v5e
topology: v5e:2x2
jax: 0.10.0
libtpu: 0.0.40
codegen_flags: <defaults>
</compile_context>

<pallas_src>
import functools

import jax
import jax.numpy as jnp
from jax.experimental import pallas as pl
from jax.experimental.pallas import tpu as pltpu


def _round_up(a: int, b: int) -> int:
    return (a + b - 1) // b * b


def _choose_f_tiling(f: int):
    """(tile_f, f_pad): lane-dense tiles, >= 2 feature blocks whenever F > 128
    (so both v7x TensorCores get work on the 'parallel' feature axis), padding
    kept to at most one 128-lane group for moderate F."""
    f_pad0 = _round_up(f, 128)
    if f_pad0 <= 128:
        return 128, 128
    if f_pad0 <= 1024:
        tile_f = _round_up(f_pad0 // 2, 128)          # exactly two feature blocks
        return tile_f, 2 * tile_f
    # Large F: fixed wide tiles, pick the width that pads least.
    f_pad, neg_t = min((_round_up(f_pad0, t), -t) for t in (512, 384, 256))
    return -neg_t, f_pad


def _make_kernel(num_x: int):
    """Kernel over grid (graph block, feature block, node block)."""

    def kernel(*refs):
        bidx_ref, inv_ref = refs[0], refs[1]
        x_refs = refs[2:2 + num_x]
        o_ref = refs[2 + num_x]
        acc_ref = refs[3 + num_x]

        k = pl.program_id(2)

        @pl.when(k == 0)
        def _():
            acc_ref[...] = jnp.zeros_like(acc_ref)

        tile_g = acc_ref.shape[0]
        tile_n = x_refs[0].shape[0]
        g0 = pl.program_id(0) * tile_g

        bidx = bidx_ref[...]                                               # (1, tile_n)
        gids = g0 + jax.lax.broadcasted_iota(jnp.int32, (tile_g, tile_n), 0)
        one_hot = (gids == bidx).astype(x_refs[0].dtype)                   # exact 0/1

        acc = acc_ref[...]
        for xr in x_refs:                                                  # 1 or 2 MXU passes
            acc = acc + jnp.dot(one_hot, xr[...],
                                preferred_element_type=jnp.float32)
        acc_ref[...] = acc

        @pl.when(k == pl.num_programs(2) - 1)
        def _():
            inv = inv_ref[:, 0:1]                                          # (tile_g, 1)
            o_ref[...] = (acc_ref[...] * inv).astype(o_ref.dtype)

    return kernel


@functools.partial(jax.jit, static_argnums=(2,), static_argnames=("tile_n",))
def vn_avg_pool(x, batch_idx, num_graphs, *, tile_n=2048):
    """global_mean_pool: x [N, N_feat, 3], batch_idx [N] -> [num_graphs, N_feat, 3].

    `num_graphs` must be a static Python int (no host sync, cacheable jit).
    """
    n, n_feat, three = x.shape
    assert three == 3, "expected vector features of shape [N, N_feat, 3]"
    num_graphs = int(num_graphs)

    f = n_feat * 3
    x_flat = x.reshape(n, f)

    # --- feature tiling ------------------------------------------------------
    tile_f, f_pad = _choose_f_tiling(f)

    # --- graph tiling --------------------------------------------------------
    g_pad = _round_up(max(num_graphs, 1), 8)
    if g_pad <= 256:
        tile_g = g_pad
    else:
        tile_g = 256
        g_pad = _round_up(g_pad, tile_g)

    # --- operand prep: bf16 streams as-is, f32 splits into bf16 hi/lo --------
    if x_flat.dtype == jnp.bfloat16:
        x_parts = (x_flat,)
    else:
        xf = x_flat.astype(jnp.float32)
        x_hi = xf.astype(jnp.bfloat16)
        x_lo = (xf - x_hi.astype(jnp.float32)).astype(jnp.bfloat16)
        x_parts = (x_hi, x_lo)
    num_x = len(x_parts)
    x_itemsize = 2
    out_itemsize = jnp.dtype(x.dtype).itemsize

    # --- node tiling: fit the double-buffered blocks to a VMEM budget --------
    budget = 40 * 1024 * 1024
    fixed = (tile_g * tile_f * 4                       # f32 accumulator scratch
             + 2 * tile_g * tile_f * out_itemsize      # double-buffered output
             + 2 * tile_g * 128 * 4)                   # inv input
    per_row = 2 * num_x * tile_f * x_itemsize + 2 * 4  # x blocks + bidx block
    tile_n = max(128, int(tile_n)) // 128 * 128
    tile_n = min(tile_n, _round_up(n, 128))
    tile_n = min(tile_n, max(128, (budget - fixed) // per_row // 128 * 128))
    n_pad = _round_up(n, tile_n)

    blk_bytes = fixed + tile_n * per_row
    vmem_limit = int(min(max(2 * blk_bytes, 32 * 1024 * 1024), 48 * 1024 * 1024))

    # --- padded operands ------------------------------------------------------
    x_parts = tuple(jnp.pad(xp, ((0, n_pad - n), (0, f_pad - f))) for xp in x_parts)
    bidx = batch_idx.astype(jnp.int32)
    bidx_p = jnp.pad(bidx, (0, n_pad - n), constant_values=-1).reshape(1, n_pad)

    # Segment counts -> reciprocals, computed once on the wrapper side
    # (replaces the old in-kernel count matmul + ones splat).
    valid = (bidx >= 0) & (bidx < num_graphs)
    cnt = jnp.zeros((g_pad,), jnp.float32).at[jnp.where(valid, bidx, 0)].add(
        valid.astype(jnp.float32))
    inv = 1.0 / jnp.maximum(cnt, 1.0)
    inv_p = jnp.broadcast_to(inv[:, None], (g_pad, 128))

    grid = (g_pad // tile_g, f_pad // tile_f, n_pad // tile_n)

    x_specs = [pl.BlockSpec((tile_n, tile_f), lambda g, fb, k: (k, fb))
               for _ in range(num_x)]

    out_flat = pl.pallas_call(
        _make_kernel(num_x),
        out_shape=jax.ShapeDtypeStruct((g_pad, f_pad), x.dtype),
        grid=grid,
        in_specs=[
            pl.BlockSpec((1, tile_n), lambda g, fb, k: (0, k)),     # batch ids
            pl.BlockSpec((tile_g, 128), lambda g, fb, k: (g, 0)),   # 1/count
            *x_specs,                                               # node features
        ],
        out_specs=pl.BlockSpec((tile_g, tile_f), lambda g, fb, k: (g, fb)),
        scratch_shapes=[
            pltpu.VMEM((tile_g, tile_f), jnp.float32),              # segment sums
        ],
        compiler_params=pltpu.CompilerParams(
            dimension_semantics=("parallel", "parallel", "arbitrary"),
            vmem_limit_bytes=vmem_limit,
        ),
    )(bidx_p, inv_p, *x_parts)

    return out_flat[:num_graphs, :f].reshape(num_graphs, n_feat, 3)


if __name__ == "__main__":
    key = jax.random.PRNGKey(0)

    # 300 nodes (-> 3 node tiles of 128 with tile_n=128), 4 vector features,
    # 2 graphs of uneven size (120 / 180 nodes).
    N, n_feat, G = 300, 4, 2
    x = jax.random.normal(key, (N, n_feat, 3), dtype=jnp.float32)
    batch_idx = jnp.concatenate(
        [jnp.zeros((120,), jnp.int32), jnp.ones((180,), jnp.int32)])

    ref = jnp.stack([x[:120].mean(axis=0), x[120:].mean(axis=0)])

    # f32 input path (bf16 hi/lo split, two MXU passes, f32 accumulation).
    out = jax.block_until_ready(vn_avg_pool(x, batch_idx, G, tile_n=128))
    assert out.shape == (G, n_feat, 3)
    assert jnp.allclose(out, ref, atol=1e-4, rtol=1e-4), (
        float(jnp.max(jnp.abs(out - ref))))

    # bf16 input path (single-operand stream).
    out_bf16 = jax.block_until_ready(
        vn_avg_pool(x.astype(jnp.bfloat16), batch_idx, G, tile_n=128))
    assert out_bf16.shape == (G, n_feat, 3)
    assert jnp.allclose(out_bf16.astype(jnp.float32), ref, atol=2e-2, rtol=2e-2)

    print("KERNEL_OK")
</pallas_src>

<mosaic_0001>
module attributes {stable_mosaic.version = 11 : i64} {
  func.func @kernel(%arg0: i32, %arg1: i32, %arg2: i32, %arg3: memref<1x128xi32, #tpu.memory_space<vmem>>, %arg4: memref<8x128xf32, #tpu.memory_space<vmem>>, %arg5: memref<128x128xbf16, #tpu.memory_space<vmem>>, %arg6: memref<128x128xbf16, #tpu.memory_space<vmem>>, %arg7: memref<8x128xf32, #tpu.memory_space<vmem>>, %arg8: memref<8x128xf32, #tpu.memory_space<vmem>>) attributes {dimension_semantics = [#tpu.dimension_semantics<parallel>, #tpu.dimension_semantics<parallel>, #tpu.dimension_semantics<arbitrary>], iteration_bounds = array<i64: 1, 1, 3>, scalar_prefetch = 0 : i64, scratch_operands = 1 : i64, tpu.core_type = #tpu.core_type<tc>, window_params = [{transform_indices = @transform_0, window_bounds = array<i64: 1, 128>}, {transform_indices = @transform_1, window_bounds = array<i64: 8, 128>}, {transform_indices = @transform_2, window_bounds = array<i64: 128, 128>}, {transform_indices = @transform_3, window_bounds = array<i64: 128, 128>}, {transform_indices = @transform_4, window_bounds = array<i64: 8, 128>}]} {
    %c0_i32 = arith.constant 0 : i32
    %0 = arith.cmpi eq, %arg2, %c0_i32 : i32
    %1 = arith.extui %0 : i1 to i32
    %c0_i32_0 = arith.constant 0 : i32
    %2 = arith.cmpi ne, %1, %c0_i32_0 : i32
    scf.if %2 {
      %cst_12 = arith.constant 0.000000e+00 : f32
      %24 = vector.broadcast %cst_12 : f32 to vector<8x128xf32>
      %c0_13 = arith.constant 0 : index
      %c0_14 = arith.constant 0 : index
      %25 = vector.load %arg8[%c0_13, %c0_14] : memref<8x128xf32, #tpu.memory_space<vmem>>, vector<8x128xf32>
      tpu.vector_store %arg8[%c0_13, %c0_14], %24 {strides = array<i32>} : memref<8x128xf32, #tpu.memory_space<vmem>>, vector<8x128xf32>,
    } else {
    }
    %c8_i32 = arith.constant 8 : i32
    %3 = arith.muli %arg0, %c8_i32 : i32
    %c0 = arith.constant 0 : index
    %c0_1 = arith.constant 0 : index
    %4 = vector.load %arg3[%c0, %c0_1] : memref<1x128xi32, #tpu.memory_space<vmem>>, vector<1x128xi32>
    %5 = tpu.iota {dimensions = array<i32: 0>} : vector<8x128xi32>
    %6 = vector.broadcast %3 : i32 to vector<8x128xi32>
    %7 = arith.addi %6, %5 : vector<8x128xi32>
    %8 = vector.broadcast %4 : vector<1x128xi32> to vector<8x128xi32>
    %9 = arith.cmpi eq, %7, %8 : vector<8x128xi32>
    %10 = arith.extui %9 : vector<8x128xi1> to vector<8x128xi32>
    %11 = arith.sitofp %10 : vector<8x128xi32> to vector<8x128xf32>
    %12 = arith.truncf %11 : vector<8x128xf32> to vector<8x128xbf16>
    %c0_2 = arith.constant 0 : index
    %c0_3 = arith.constant 0 : index
    %13 = vector.load %arg8[%c0_2, %c0_3] : memref<8x128xf32, #tpu.memory_space<vmem>>, vector<8x128xf32>
    %c0_4 = arith.constant 0 : index
    %c0_5 = arith.constant 0 : index
    %14 = vector.load %arg5[%c0_4, %c0_5] : memref<128x128xbf16, #tpu.memory_space<vmem>>, vector<128x128xbf16>
    %cst = arith.constant dense<0.000000e+00> : vector<8x128xf32>
    %15 = tpu.matmul %12, %14, %cst {dimension_numbers = #tpu.dot_dimension_numbers<[1], [0], [0], [1], [0, 0, 1, 1], [], []>} : vector<8x128xbf16>, vector<128x128xbf16>, vector<8x128xf32> -> vector<8x128xf32>
    %16 = arith.addf %13, %15 : vector<8x128xf32>
    %c0_6 = arith.constant 0 : index
    %c0_7 = arith.constant 0 : index
    %17 = vector.load %arg6[%c0_6, %c0_7] : memref<128x128xbf16, #tpu.memory_space<vmem>>, vector<128x128xbf16>
    %cst_8 = arith.constant dense<0.000000e+00> : vector<8x128xf32>
    %18 = tpu.matmul %12, %17, %cst_8 {dimension_numbers = #tpu.dot_dimension_numbers<[1], [0], [0], [1], [0, 0, 1, 1], [], []>} : vector<8x128xbf16>, vector<128x128xbf16>, vector<8x128xf32> -> vector<8x128xf32>
    %19 = arith.addf %16, %18 : vector<8x128xf32>
    %c0_9 = arith.constant 0 : index
    %c0_10 = arith.constant 0 : index
    %20 = vector.load %arg8[%c0_9, %c0_10] : memref<8x128xf32, #tpu.memory_space<vmem>>, vector<8x128xf32>
    tpu.vector_store %arg8[%c0_9, %c0_10], %19 {strides = array<i32>} : memref<8x128xf32, #tpu.memory_space<vmem>>, vector<8x128xf32>,
    %c2_i32 = arith.constant 2 : i32
    %21 = arith.cmpi eq, %arg2, %c2_i32 : i32
    %22 = arith.extui %21 : i1 to i32
    %c0_i32_11 = arith.constant 0 : i32
    %23 = arith.cmpi ne, %22, %c0_i32_11 : i32
    scf.if %23 {
      %c0_12 = arith.constant 0 : index
      %c0_13 = arith.constant 0 : index
      %24 = vector.load %arg4[%c0_12, %c0_13] : memref<8x128xf32, #tpu.memory_space<vmem>>, vector<8x1xf32>
      %c0_14 = arith.constant 0 : index
      %c0_15 = arith.constant 0 : index
      %25 = vector.load %arg8[%c0_14, %c0_15] : memref<8x128xf32, #tpu.memory_space<vmem>>, vector<8x128xf32>
      %26 = vector.broadcast %24 : vector<8x1xf32> to vector<8x128xf32>
      %27 = arith.mulf %25, %26 : vector<8x128xf32>
      %c0_16 = arith.constant 0 : index
      %c0_17 = arith.constant 0 : index
      %28 = vector.load %arg7[%c0_16, %c0_17] : memref<8x128xf32, #tpu.memory_space<vmem>>, vector<8x128xf32>
      tpu.vector_store %arg7[%c0_16, %c0_17], %27 {strides = array<i32>} : memref<8x128xf32, #tpu.memory_space<vmem>>, vector<8x128xf32>,
    } else {
    }
    return
  }
  func.func @transform_0(%arg0: i32, %arg1: i32, %arg2: i32) -> (i32, i32) {
    %c0_i32 = arith.constant 0 : i32
    %c0_i32_0 = arith.constant 0 : i32
    return %c0_i32, %arg2 : i32, i32
  }
  func.func @transform_1(%arg0: i32, %arg1: i32, %arg2: i32) -> (i32, i32) {
    %c0_i32 = arith.constant 0 : i32
    %c0_i32_0 = arith.constant 0 : i32
    return %arg0, %c0_i32 : i32, i32
  }
  func.func @transform_2(%arg0: i32, %arg1: i32, %arg2: i32) -> (i32, i32) {
    %c0_i32 = arith.constant 0 : i32
    return %arg2, %arg1 : i32, i32
  }
  func.func @transform_3(%arg0: i32, %arg1: i32, %arg2: i32) -> (i32, i32) {
    %c0_i32 = arith.constant 0 : i32
    return %arg2, %arg1 : i32, i32
  }
  func.func @transform_4(%arg0: i32, %arg1: i32, %arg2: i32) -> (i32, i32) {
    %c0_i32 = arith.constant 0 : i32
    return %arg0, %arg1 : i32, i32
  }
}

</mosaic_0001>

<bundles_post_ra>
// kernel: vn_avg_pool.1
= control target key start
LH: loop header
LB: loop body
LE: loop exit
PB: predicated region body
PF: predicated region fallthrough
CT: control target
= control target key end

     0   :  { %s781_s15 = smov 0   ;;  %s783_s16 = smov 0   ;;  %s858_s0 = inlined_call_operand.vmem [shape: s32[1,384], index: 0, kind: input, shape index: {}]   ;;  %s859_s1 = inlined_call_operand.vmem [shape: f32[8,128], index: 1, kind: input, shape index: {}]   ;;  %s860_s2 = inlined_call_operand.vmem [shape: bf16[384,128], index: 2, kind: input, shape index: {}]   ;;  %s861_s3 = inlined_call_operand.vmem [shape: bf16[384,128], index: 3, kind: input, shape index: {}]   ;;  %s862_s4 = inlined_call_operand.vmem [shape: f32[8,128], index: 4, kind: output, shape index: {}]  }
   0x1   :  { %s785_s17 = smov 0  }
   0x2 LB: > { %s26_s18 = sadd.s32 1, %s747_s16  ;;  %p605_p0 = scmp.ge.s32.totalorder %s751_s17, 1  ;;  %s751_s17 = sphi %s785_s17, %s14_s17   ;;  %s747_s16 = sphi %s783_s16, %s864_s16   ;;  %s743_s15 = sphi %s781_s15, %s863_s15  }
   0x3   : > { %p27_p1 = scmp.ge.s32.totalorder %s26_s18, 3  ;;  %p222_p2 = scmp.lt.s32.totalorder %s751_s17, 4 }
   0x5   : > { %s866_s18 = smov (%p27_p1, %s26_s18), 0  ;;  %p223_p3 = pnand %p605_p0, %p222_p2 }
   0x6   : > { %p268_p4 = scmp.lt.s32.totalorder (!%p223_p3), %s743_s15, 2  ;;  %s606_s19 = sshll.u32 (!%p223_p3), %s743_s15, 4 }
   0x7   : > { %226 = sbr.rel (%p223_p3) target bundleno = 307 (0x133), region = 36  ;;  %p276_p5 = scmp.lt.s32.totalorder (!%p223_p3), %s606_s19, 47 }
   0x8   : > { %p610_p6 = scmp.ne.s32.totalorder (!%p223_p3), %s743_s15, 0 }
   0xc   : > { %s804_s20 = scalar_select %p268_p4, %s743_s15, 2 }
   0xd   : > { %s868_s19 = smov (!%p276_p5, %s606_s19), 47  ;;  %303 = sbr.rel (%p610_p6) target bundleno = 20 (0x14), region = 40 }
   0xe   : > { %s270_s23 = scalar_lea.vmem %s858_s0, %s804_s20  ;;  %s607_s24 = sshll.u32 %s868_s19, 2 }
   0xf   : > { %s813_s27 = scalar_lea.vmem %s860_s2, %s607_s24  ;;  %s818_s30 = scalar_lea.vmem %s861_s3, %s607_s24 }
  0x12   : > { %v753_v0 = vmov 0.0  }
  0x13   : > { %304 = vst [vmem:[#allocation2] sm:$0xff] %v753_v0 }
  0x14 PF: > { %v691_v1 = vld [vmem:[%s813_s27 + $0x38] sm:$0xff]  ;;  %v690_v3 = vld [vmem:[%s813_s27 + $0x30] sm:$0xff]  ;;  %v689_v5 = vld [vmem:[%s813_s27 + $0x28] sm:$0xff]  ;;  %v307_v13 = vlaneseq  ;;  %v754_v20 = vmov 1.0|1.0   ;;  %p680_p7 = scmp.ne.s32.totalorder %s743_s15, 2 }
  0x15   : > { %v699_v2 = vld [vmem:[%s818_s30 + $0x38] sm:$0xff]  ;;  %381 = vmatpush.bf16.msra.mxu0 %v691_v1  ;;  %v698_v4 = vld [vmem:[%s818_s30 + $0x30] sm:$0xff]  ;;  %v697_v6 = vld [vmem:[%s818_s30 + $0x28] sm:$0xff] }
  0x16   : > { %459 = vmatpush.bf16.msra.mxu1 %v699_v2  ;;  %v688_v7 = vld [vmem:[%s813_s27 + $0x20] sm:$0xff]  ;;  %v687_v9 = vld [vmem:[%s813_s27 + $0x18] sm:$0xff]  ;;  %v686_v11 = vld [vmem:[%s813_s27 + $0x10] sm:$0xff]  ;;  %v308_v16 = vshrl.u32 %v307_v13, 7 }
  0x17   : > { %v696_v8 = vld [vmem:[%s818_s30 + $0x20] sm:$0xff]  ;;  %v695_v10 = vld [vmem:[%s818_s30 + $0x18] sm:$0xff]  ;;  %v694_v12 = vld [vmem:[%s818_s30 + $0x10] sm:$0xff] }
  0x18   : > { %v685_v14 = vld [vmem:[%s813_s27 + $0x8] sm:$0xff]  ;;  %v727_v17 = vld [vmem:[%s270_s23] ss:$0 sm:$0xff] }
  0x19   : > { %382 = vmatpush.bf16.msra.mxu0 %v690_v3  ;;  %v693_v15 = vld [vmem:[%s818_s30 + $0x8] sm:$0xff]  ;;  %v684_v18 = vld [vmem:[%s813_s27] sm:$0xff]  ;;  %vm312_vm0 = vcmp.eq.s32.totalorder %v308_v16, %v727_v17 }
  0x1a   : > { %460 = vmatpush.bf16.msra.mxu1 %v698_v4  ;;  %v692_v19 = vld [vmem:[%s818_s30] sm:$0xff]  ;;  %vm644_vm1 = vmpackc.low %vm312_vm0, %vm312_vm0 }
  0x1b   : > { %v316_v21 = vld [vmem:[#allocation2] sm:$0xff] }
  0x1d   : > { %383 = vmatpush.bf16.msra.mxu0 %v689_v5 }
  0x1e   : > { %461 = vmatpush.bf16.msra.mxu1 %v697_v6 }
  0x21   : > { %384 = vmatpush.bf16.msra.mxu0 %v688_v7 }
  0x22   : > { %462 = vmatpush.bf16.msra.mxu1 %v696_v8 }
  0x25   : > { %385 = vmatpush.bf16.msra.mxu0 %v687_v9 }
  0x26   : > { %463 = vmatpush.bf16.msra.mxu1 %v695_v10 }
  0x29   : > { %386 = vmatpush.bf16.msra.mxu0 %v686_v11 }
  0x2a   : > { %464 = vmatpush.bf16.msra.mxu1 %v694_v12 }
  0x2d   : > { %387 = vmatpush.bf16.msra.mxu0 %v685_v14 }
  0x2e   : > { %465 = vmatpush.bf16.msra.mxu1 %v693_v15 }
  0x31   : > { %388 = vmatpush.bf16.msra.mxu0 %v684_v18 }
  0x32   : > { %466 = vmatpush.bf16.msra.mxu1 %v692_v19 }
  0x34   : > { %645 = vmatmul.msk.bf16.vlgmr.msra.gmra.mxu0 %vm644_vm1, %v754_v20 }
  0x35   : > { %679 = vmatmul.msk.bf16.vlgmr.msra.gmra.mxu1 %vm644_vm1, %v754_v20 }
  0xb1   : > { %v390_v22 = vpop.f32.mrf.mxu0 }
  0xb2   : > { %v468_v23 = vpop.f32.mrf.mxu1  ;;  %v394_v24 = vadd.f32 %v390_v22, %v316_v21 }
  0xb4   : > { %v472_v25 = vadd.f32 %v468_v23, %v394_v24 }
  0xb6   : > { %473 = vst [vmem:[#allocation2] sm:$0xff] %v472_v25  ;;  %477 = sbr.rel (%p680_p7) target bundleno = 307 (0x133), region = 44 }
  0xb9   : > { %v392_v26 = vpop.f32.mrf.mxu0 }
  0xba   : > { %v470_v27 = vpop.f32.mrf.mxu1 }
  0xbb   : > { %v478_v28 = vld [vmem:[%s859_s1] sm:$0xff]  ;;  %v755_v29 = vmov 0  }
  0xbc   : > { %728 = vset.pattern.permute.xlu0 %v755_v29 }
  0xbd   : > { %482 = vperm.xlu0 %728, %v478_v28   ;;  %v479_v30 = vld [vmem:[#allocation2] sm:$0xff] }
 0x12f   : > { %v483_v31 = vpop.permute.xlu0 %482 }
 0x130   : > { %v485_v32 = vmul.f32 %v483_v31, %v479_v30 }
 0x132   : > { %486 = vst [vmem:[%s862_s4] sm:$0xff] %v485_v32 }
 0x133 PF: > { %s14_s17 = sadd.s32 1, %s751_s17   ;;  %s863_s15 = smov %s747_s16 }
 0x134   : > { %p11_p8 = scmp.ge.s32.totalorder %s14_s17, 5   ;;  %s864_s16 = smov %s866_s18 }
 0x136   :  { %13 = sbr.rel (!%p11_p8) target bundleno = 2 (0x2), region = 83 }

</bundles_post_ra>
